<compile_context>
chip_gen: v7x
topology: tpu7x:2x2x1
jax: 0.10.0
libtpu: 0.0.40
codegen_flags: <defaults>
</compile_context>

<pallas_src>
import jax
import jax.numpy as jnp
import numpy as np
from jax import lax
from jax.experimental import pallas as pl
from jax.experimental.pallas import tpu as pltpu

LRELU_GAIN = float(np.sqrt(2.0))  # util.lrelu_gain (He gain for leaky-relu)
EPS = 1e-8                        # util.apply_weight_norm epsilon


def _round_up(n, m):
    return ((n + m - 1) // m) * m


def _largest_dividing_tile(total, cap):
    """Largest multiple of 128 <= min(cap, total) that divides total (total % 128 == 0)."""
    t = min(int(cap), int(total))
    t = max(128, (t // 128) * 128)
    while total % t:
        t -= 128
    return t


def _vmem_capacity_bytes():
    try:
        info = pltpu.get_tpu_info()
        cap = getattr(info, "vmem_capacity_bytes", None)
        if cap:
            return int(cap)
    except Exception:
        pass
    return 64 * 2 ** 20  # conservative default (v7x per-core VMEM)


def _maybe_triple_buffered(block_shape, index_map, triple):
    """x-stream BlockSpec; 3-deep buffering for DMA-bound configs when supported."""
    if triple:
        try:
            return pl.BlockSpec(block_shape, index_map, pipeline_mode=pl.Buffered(3))
        except Exception:
            pass
    return pl.BlockSpec(block_shape, index_map)


# ---------------------------------------------------------------------------
# Kernels
# ---------------------------------------------------------------------------
def _modconv_batched_kernel(x_ref, w_ref, d_ref, b_ref, o_ref):
    # x_ref: (1, Cin_p, TILE_HW)   current (batch, hw-tile) block, input dtype
    # w_ref: (1, Cout_p, Cin_p)    per-batch style-modulated he-scaled weight (compute dtype)
    # d_ref: (1, Cout_p, 1)        per-batch demod coeff * gain (f32)
    # b_ref: (Cout_p, 1)           bias * gain (f32)
    # o_ref: (1, Cout_p, TILE_HW)  output block
    w = w_ref[0]                                    # (Cout_p, Cin_p), stays resident per batch
    x = x_ref[0].astype(w.dtype)                    # no-op cast for f32/bf16 inputs
    y = lax.dot_general(w, x, (((1,), (0,)), ((), ())),
                        preferred_element_type=jnp.float32)          # MXU, f32 accumulation
    o_ref[0] = (y * d_ref[0] + b_ref[...]).astype(o_ref.dtype)       # single FMA epilogue


def _modconv_packed_kernel(x_ref, w_ref, s_ref, d_ref, b_ref, o_ref):
    # Small-spatial path: batch elements packed into the lane/N axis.
    # x_ref: (Cin_p, TILE_N)   packed columns (batch*HW), input dtype
    # w_ref: (Cout_p, Cin_p)   shared he-scaled transposed weight (compute dtype)
    # s_ref: (Cin_p, TILE_N)   per-column style scale (f32)
    # d_ref: (Cout_p, TILE_N)  per-column demod*gain (f32)
    # b_ref: (Cout_p, 1)       bias*gain (f32)
    w = w_ref[...]
    xs = x_ref[...].astype(w.dtype) * s_ref[...].astype(w.dtype)
    y = lax.dot_general(w, xs, (((1,), (0,)), ((), ())),
                        preferred_element_type=jnp.float32)
    o_ref[...] = (y * d_ref[...] + b_ref[...]).astype(o_ref.dtype)


# ---------------------------------------------------------------------------
# Wrapper
# ---------------------------------------------------------------------------
def conv2d_transpose_normalized_lr_stylegan2(x, style, weight, bias,
                                             he_constant, gain, *, tile_hw=None):
    """x: (B, Cin, H, W) NCHW; style: (B, Cin); weight: (Cin, Cout, 1, 1); bias: (Cout,) or None."""
    B, Cin, H, W = x.shape
    Cin_w, Cout, kh, kw = weight.shape
    assert Cin_w == Cin
    assert kh == 1 and kw == 1, "only kernel_size=1, stride=1, padding=0 supported"
    HW = H * W
    out_dtype = x.dtype

    # MXU compute dtype: bf16 inputs stay bf16 (f32 accumulation), otherwise f32.
    compute_dtype = jnp.bfloat16 if x.dtype == jnp.bfloat16 else jnp.float32
    c_item = jnp.dtype(compute_dtype).itemsize
    x_item = jnp.dtype(x.dtype).itemsize
    o_item = jnp.dtype(out_dtype).itemsize

    # dtype-native sublane alignment: bf16 packs two rows per sublane -> align to 16.
    sub = 16 if compute_dtype == jnp.bfloat16 else 8
    cin_p = _round_up(Cin, sub)
    cout_p = _round_up(Cout, sub)

    if bias is None:
        bias = jnp.zeros((Cout,), jnp.float32)

    # ---- one-time (wrapper-side, tiny) prep --------------------------------
    style_f = style.astype(jnp.float32)
    w_he = weight.reshape(Cin, Cout).astype(jnp.float32) * he_constant       # (Cin, Cout)
    # demod * gain: d_gain[b,o] = gain * rsqrt(sum_i (he*W[i,o]*s[b,i])^2 + eps)
    denom = jnp.einsum('bi,io->bo', style_f ** 2, w_he ** 2,
                       precision=lax.Precision.HIGHEST) + EPS                # (B, Cout)
    d_gain = gain * lax.rsqrt(denom)
    b_col = jnp.pad(bias.astype(jnp.float32) * gain,
                    (0, cout_p - Cout)).reshape(cout_p, 1)

    # Generation-aware VMEM budget (v5e/v6e: 128 MiB VMEM -> bigger tiles; v7x: 64 MiB).
    vmem_cap = _vmem_capacity_bytes()
    big_vmem = vmem_cap >= 96 * 2 ** 20
    budget = (28 if big_vmem else 12) * 2 ** 20
    limit_cap = (80 if big_vmem else 48) * 2 ** 20

    if HW < 128:
        # ------------------- packed small-spatial path ----------------------
        # Pack batches into the lane axis so the MXU N dimension is filled
        # instead of padding every 4x4/8x8 batch element up to 128 columns.
        N = B * HW
        n_p = _round_up(N, 128)
        per_col = 3 * cin_p * x_item + 2 * cout_p * o_item + 2 * (cin_p + cout_p) * 4
        tile_n = _largest_dividing_tile(
            n_p, max(128, min(2048, (budget // per_col) // 128 * 128)))
        n_t = n_p // tile_n

        x_cols = jnp.pad(x.reshape(B, Cin, HW).transpose(1, 0, 2).reshape(Cin, N),
                         ((0, cin_p - Cin), (0, n_p - N)))
        s_cols = jnp.pad(jnp.broadcast_to(style_f.T[:, :, None],
                                          (Cin, B, HW)).reshape(Cin, N),
                         ((0, cin_p - Cin), (0, n_p - N)))
        d_cols = jnp.pad(jnp.broadcast_to(d_gain.T[:, :, None],
                                          (Cout, B, HW)).reshape(Cout, N),
                         ((0, cout_p - Cout), (0, n_p - N)))
        wt = jnp.pad(w_he.T, ((0, cout_p - Cout), (0, cin_p - Cin))).astype(compute_dtype)

        x_blk = cin_p * tile_n * x_item
        o_blk = cout_p * tile_n * o_item
        sd_blk = (cin_p + cout_p) * tile_n * 4
        vmem_limit = int(min(limit_cap,
                             max(8 * 2 ** 20,
                                 3 * (x_blk + o_blk + sd_blk)
                                 + 2 * cout_p * cin_p * c_item + (1 << 20))))

        out2 = pl.pallas_call(
            _modconv_packed_kernel,
            out_shape=jax.ShapeDtypeStruct((cout_p, n_p), out_dtype),
            grid_spec=pltpu.PrefetchScalarGridSpec(
                num_scalar_prefetch=0,
                grid=(n_t,),
                in_specs=[
                    pl.BlockSpec((cin_p, tile_n), lambda t: (0, t)),    # packed x columns
                    pl.BlockSpec((cout_p, cin_p), lambda t: (0, 0)),    # shared weight (resident)
                    pl.BlockSpec((cin_p, tile_n), lambda t: (0, t)),    # per-column style
                    pl.BlockSpec((cout_p, tile_n), lambda t: (0, t)),   # per-column demod*gain
                    pl.BlockSpec((cout_p, 1), lambda t: (0, 0)),        # bias*gain
                ],
                out_specs=pl.BlockSpec((cout_p, tile_n), lambda t: (0, t)),
            ),
            compiler_params=pltpu.CompilerParams(
                dimension_semantics=("parallel",),
                vmem_limit_bytes=vmem_limit),
        )(x_cols, wt, s_cols, d_cols, b_col)

        out = out2[:Cout, :N]
        return out.reshape(Cout, B, HW).transpose(1, 0, 2).reshape(B, Cout, H, W)

    # --------------------- batched large-spatial path -----------------------
    hw_128 = _round_up(HW, 128)   # pad HW only to the next lane multiple
    if tile_hw is None:
        per_col = 3 * cin_p * x_item + 2 * cout_p * o_item
        tile_hw = _largest_dividing_tile(
            hw_128, max(128, min(2048, (budget // per_col) // 128 * 128)))
    tile_hw = int(min(tile_hw, hw_128))
    assert tile_hw % 128 == 0
    hw_p = _round_up(HW, tile_hw)
    n_hw = hw_p // tile_hw

    # x stays in its input dtype (cast on the fly in-kernel); pad only when needed.
    x3 = x.reshape(B, Cin, HW)
    if cin_p != Cin or hw_p != HW:
        x3 = jnp.pad(x3, ((0, 0), (0, cin_p - Cin), (0, hw_p - HW)))

    # Per-batch style-modulated weight, built once at f32, cast to the MXU dtype.
    # wtb[b, o, i] = he * W[i, o] * style[b, i]
    wtb = w_he.T[None, :, :] * style_f[:, None, :]                           # (B, Cout, Cin)
    wtb = jnp.pad(wtb, ((0, 0), (0, cout_p - Cout), (0, cin_p - Cin))).astype(compute_dtype)
    d3 = jnp.pad(d_gain, ((0, 0), (0, cout_p - Cout))).reshape(B, cout_p, 1)

    x_blk = cin_p * tile_hw * x_item
    o_blk = cout_p * tile_hw * o_item
    w_blk = cout_p * cin_p * c_item
    vmem_limit = int(min(limit_cap,
                         max(8 * 2 ** 20,
                             3 * (x_blk + o_blk) + 2 * w_blk + (1 << 20))))

    # Triple-buffer the x stream only when clearly DMA-bound (few channels, many tiles).
    triple = (cin_p <= 64) and (cout_p <= 64) and (n_hw >= 4)

    out3 = pl.pallas_call(
        _modconv_batched_kernel,
        out_shape=jax.ShapeDtypeStruct((B, cout_p, hw_p), out_dtype),
        grid_spec=pltpu.PrefetchScalarGridSpec(
            num_scalar_prefetch=0,
            grid=(B, n_hw),                                   # B outer -> weight DMA once/batch
            in_specs=[
                _maybe_triple_buffered((1, cin_p, tile_hw), lambda b, t: (b, 0, t), triple),
                pl.BlockSpec((1, cout_p, cin_p), lambda b, t: (b, 0, 0)),  # per-batch weight
                pl.BlockSpec((1, cout_p, 1), lambda b, t: (b, 0, 0)),      # demod*gain
                pl.BlockSpec((cout_p, 1), lambda b, t: (0, 0)),            # bias*gain (shared)
            ],
            out_specs=pl.BlockSpec((1, cout_p, tile_hw), lambda b, t: (b, 0, t)),
        ),
        compiler_params=pltpu.CompilerParams(
            dimension_semantics=("parallel", "parallel"),
            vmem_limit_bytes=vmem_limit),
    )(x3, wtb, d3, b_col)

    out = out3[:, :Cout, :HW]           # no-op slice when no padding was added
    return out.reshape(B, Cout, H, W)


# ---------------------------------------------------------------------------
# Reference (pure JAX replica of the PyTorch forward) and self-test
# ---------------------------------------------------------------------------
def _reference(x, style, weight, bias, he_constant, gain):
    B, Cin, H, W = x.shape
    Cout = weight.shape[1]
    w = (weight.astype(jnp.float32) * he_constant)[None]            # (1, Cin, Cout, 1, 1)
    s = style.astype(jnp.float32).reshape(B, Cin, 1, 1, 1)
    w = s * w                                                        # modulation
    norm = jnp.sqrt(jnp.sum(w ** 2, axis=(1, 3, 4), keepdims=True) + EPS)
    w = w / norm                                                     # apply_weight_norm
    y = jnp.einsum('bio,bihw->bohw', w[:, :, :, 0, 0], x.astype(jnp.float32),
                   precision=lax.Precision.HIGHEST)
    y = y + bias.astype(jnp.float32).reshape(1, Cout, 1, 1)
    return (y * gain).astype(x.dtype)


if __name__ == "__main__":
    key = jax.random.PRNGKey(0)
    kx, ks, kw, kx2, ks2, kw2 = jax.random.split(key, 6)

    # Tolerance note: the kernel algebra is exact; the slack covers possible MXU
    # pass-precision differences between the in-kernel f32 matmul and the XLA
    # HIGHEST-precision reference einsum (structural bugs would give O(1) errors).
    RTOL = ATOL = 2e-2

    # --- large-spatial path: grid over (batch, HW tiles), per-batch modulated weight ---
    B, Cin, Cout, H, W, K = 2, 4, 8, 16, 16, 1
    he_constant = LRELU_GAIN / float(Cin * K * K) ** 0.5
    x = jax.random.normal(kx, (B, Cin, H, W), jnp.float32)
    style = jax.random.normal(ks, (B, Cin), jnp.float32)
    weight = jax.random.normal(kw, (Cin, Cout, K, K), jnp.float32)   # reset_parameters(): N(0,1)
    bias = jnp.zeros((Cout,), jnp.float32)                           # reset_parameters(): 0

    out = conv2d_transpose_normalized_lr_stylegan2(
        x, style, weight, bias, he_constant, LRELU_GAIN, tile_hw=128)  # 2 HW tiles / batch
    out = jax.block_until_ready(out)
    ref = _reference(x, style, weight, bias, he_constant, LRELU_GAIN)
    assert out.shape == (B, Cout, H, W)
    np.testing.assert_allclose(np.asarray(out), np.asarray(ref), rtol=RTOL, atol=ATOL)

    # --- small-spatial path: 4x4 layer, batches packed into the lane axis ---
    B2, Cin2, Cout2, H2, W2 = 2, 4, 8, 4, 4
    he2 = LRELU_GAIN / float(Cin2) ** 0.5
    x2 = jax.random.normal(kx2, (B2, Cin2, H2, W2), jnp.float32)
    style2 = jax.random.normal(ks2, (B2, Cin2), jnp.float32)
    weight2 = jax.random.normal(kw2, (Cin2, Cout2, 1, 1), jnp.float32)
    bias2 = jnp.zeros((Cout2,), jnp.float32)

    out2 = conv2d_transpose_normalized_lr_stylegan2(
        x2, style2, weight2, bias2, he2, LRELU_GAIN)
    out2 = jax.block_until_ready(out2)
    ref2 = _reference(x2, style2, weight2, bias2, he2, LRELU_GAIN)
    assert out2.shape == (B2, Cout2, H2, W2)
    np.testing.assert_allclose(np.asarray(out2), np.asarray(ref2), rtol=RTOL, atol=ATOL)

    print("KERNEL_OK")
</pallas_src>

<mosaic_0001>
module attributes {stable_mosaic.version = 11 : i64} {
  func.func @_modconv_batched_kernel(%arg0: i32, %arg1: i32, %arg2: memref<1x8x128xf32, #tpu.memory_space<vmem>>, %arg3: memref<1x8x8xf32, #tpu.memory_space<vmem>>, %arg4: memref<1x8x1xf32, #tpu.memory_space<vmem>>, %arg5: memref<8x1xf32, #tpu.memory_space<vmem>>, %arg6: memref<1x8x128xf32, #tpu.memory_space<vmem>>) attributes {dimension_semantics = [#tpu.dimension_semantics<parallel>, #tpu.dimension_semantics<parallel>], iteration_bounds = array<i64: 2, 2>, scalar_prefetch = 0 : i64, scratch_operands = 0 : i64, tpu.core_type = #tpu.core_type<tc>, window_params = [{transform_indices = @transform_0, window_bounds = array<i64: 1, 8, 128>}, {transform_indices = @transform_1, window_bounds = array<i64: 1, 8, 8>}, {transform_indices = @transform_2, window_bounds = array<i64: 1, 8, 1>}, {pipeline_mode = #tpu.pipeline_mode<synchronous>, transform_indices = @transform_3, window_bounds = array<i64: 8, 1>}, {transform_indices = @transform_4, window_bounds = array<i64: 1, 8, 128>}]} {
    %c0 = arith.constant 0 : index
    %c0_0 = arith.constant 0 : index
    %c0_1 = arith.constant 0 : index
    %0 = vector.load %arg3[%c0, %c0_0, %c0_1] : memref<1x8x8xf32, #tpu.memory_space<vmem>>, vector<1x8x8xf32>
    %1 = vector.shape_cast %0 : vector<1x8x8xf32> to vector<8x8xf32>
    %c0_2 = arith.constant 0 : index
    %c0_3 = arith.constant 0 : index
    %c0_4 = arith.constant 0 : index
    %2 = vector.load %arg2[%c0_2, %c0_3, %c0_4] : memref<1x8x128xf32, #tpu.memory_space<vmem>>, vector<1x8x128xf32>
    %3 = vector.shape_cast %2 : vector<1x8x128xf32> to vector<8x128xf32>
    %cst = arith.constant dense<0.000000e+00> : vector<8x128xf32>
    %4 = tpu.matmul %1, %3, %cst {dimension_numbers = #tpu.dot_dimension_numbers<[1], [0], [0], [1], [0, 0, 1, 1], [], []>} : vector<8x8xf32>, vector<8x128xf32>, vector<8x128xf32> -> vector<8x128xf32>
    %c0_5 = arith.constant 0 : index
    %c0_6 = arith.constant 0 : index
    %c0_7 = arith.constant 0 : index
    %5 = vector.load %arg4[%c0_5, %c0_6, %c0_7] : memref<1x8x1xf32, #tpu.memory_space<vmem>>, vector<1x8x1xf32>
    %6 = vector.shape_cast %5 : vector<1x8x1xf32> to vector<8x1xf32>
    %7 = vector.broadcast %6 : vector<8x1xf32> to vector<8x128xf32>
    %8 = arith.mulf %4, %7 : vector<8x128xf32>
    %c0_8 = arith.constant 0 : index
    %c0_9 = arith.constant 0 : index
    %9 = vector.load %arg5[%c0_8, %c0_9] : memref<8x1xf32, #tpu.memory_space<vmem>>, vector<8x1xf32>
    %10 = vector.broadcast %9 : vector<8x1xf32> to vector<8x128xf32>
    %11 = arith.addf %8, %10 : vector<8x128xf32>
    %c0_10 = arith.constant 0 : index
    %c0_11 = arith.constant 0 : index
    %c0_12 = arith.constant 0 : index
    %12 = vector.load %arg6[%c0_10, %c0_11, %c0_12] : memref<1x8x128xf32, #tpu.memory_space<vmem>>, vector<1x8x128xf32>
    %13 = vector.shape_cast %12 : vector<1x8x128xf32> to vector<8x128xf32>
    %14 = vector.shape_cast %11 : vector<8x128xf32> to vector<1x8x128xf32>
    tpu.vector_store %arg6[%c0_10, %c0_11, %c0_12], %14 {strides = array<i32>} : memref<1x8x128xf32, #tpu.memory_space<vmem>>, vector<1x8x128xf32>,
    return
  }
  func.func @transform_0(%arg0: i32, %arg1: i32) -> (i32, i32, i32) {
    %c0_i32 = arith.constant 0 : i32
    %c0_i32_0 = arith.constant 0 : i32
    return %arg0, %c0_i32, %arg1 : i32, i32, i32
  }
  func.func @transform_1(%arg0: i32, %arg1: i32) -> (i32, i32, i32) {
    %c0_i32 = arith.constant 0 : i32
    %c0_i32_0 = arith.constant 0 : i32
    %c0_i32_1 = arith.constant 0 : i32
    return %arg0, %c0_i32, %c0_i32_0 : i32, i32, i32
  }
  func.func @transform_2(%arg0: i32, %arg1: i32) -> (i32, i32, i32) {
    %c0_i32 = arith.constant 0 : i32
    %c0_i32_0 = arith.constant 0 : i32
    %c0_i32_1 = arith.constant 0 : i32
    return %arg0, %c0_i32, %c0_i32_0 : i32, i32, i32
  }
  func.func @transform_3(%arg0: i32, %arg1: i32) -> (i32, i32) {
    %c0_i32 = arith.constant 0 : i32
    %c0_i32_0 = arith.constant 0 : i32
    %c0_i32_1 = arith.constant 0 : i32
    return %c0_i32, %c0_i32_0 : i32, i32
  }
  func.func @transform_4(%arg0: i32, %arg1: i32) -> (i32, i32, i32) {
    %c0_i32 = arith.constant 0 : i32
    %c0_i32_0 = arith.constant 0 : i32
    return %arg0, %c0_i32, %arg1 : i32, i32, i32
  }
}

</mosaic_0001>

<bundles_post_ra>
// kernel: tpu_custom_call.1
= control target key start
LH: loop header
LB: loop body
LE: loop exit
PB: predicated region body
PF: predicated region fallthrough
CT: control target
= control target key end

     0   :  { %9 = vsyncpa [#allocation3], 0  ;;  %s957_s0 = inlined_call_operand.hbm [shape: f32[2,8,256], index: 0, kind: input, shape index: {}]   ;;  %s958_s1 = inlined_call_operand.vmem [shape: f32[2,8,8], index: 1, kind: input, shape index: {}]   ;;  %s959_s2 = inlined_call_operand.vmem [shape: f32[2,8,1], index: 2, kind: input, shape index: {}]   ;;  %s960_s3 = inlined_call_operand.vmem [shape: f32[8,1], index: 3, kind: input, shape index: {}]   ;;  %s961_s4 = inlined_call_operand.hbm [shape: f32[2,8,256], index: 4, kind: output, shape index: {}]  }
   0x1   :  { %11 = vsyncpa [#allocation3 + $0x1], 0 }
   0x2   :  { %12 = vsyncpa [#allocation4], 0 }
   0x3   :  { %14 = vsyncpa [#allocation4 + $0x1], 0  ;;  %s748_s15 = smov 0   ;;  %s750_s16 = smov 0  }
   0x4   :  { %s752_s17 = smov 0   ;;  %s754_s18 = smov 0  }
   0x5   :  { %s756_s19 = smov 0   ;;  %s758_s20 = smov 0  }
   0x6   :  { %s760_s21 = smov 0   ;;  %s762_s22 = smov 0  }
   0x7 LB: > { %s481_s23 = sadd.s32 4294967295, %s716_s22   ;;  %s482_s24 = sadd.s32 4294967294, %s716_s22   ;;  %s716_s22 = sphi %s762_s22, %s20_s22   ;;  %s712_s21 = sphi %s760_s21, %s981_s21   ;;  %s708_s20 = sphi %s758_s20, %s980_s20   ;;  %s704_s19 = sphi %s756_s19, %s979_s19   ;;  %s700_s18 = sphi %s754_s18, %s978_s18   ;;  %s696_s17 = sphi %s752_s17, %s977_s17   ;;  %s692_s16 = sphi %s750_s16, %s976_s16   ;;  %s688_s15 = sphi %s748_s15, %s975_s15  }
   0x8   : > { %s29_s25 = sadd.s32 1, %s708_s20  ;;  %s32_s26 = sadd.s32 1, %s712_s21 }
   0x9   : > { %p30_p0 = scmp.ge.s32.totalorder %s29_s25, 2  ;;  %s41_s27 = sadd.s32 1, %s696_s17 }
   0xa   : > { %p48_p1 = scmp.ne.s32.totalorder %s696_s17, %s692_s16  ;;  %p49_p2 = scmp.eq.s32.totalorder %s716_s22, 0 }
   0xb   : > { %s983_s25 = smov (%p30_p0, %s29_s25), 0  ;;  %s985_s26 = smov (!%p30_p0, %s32_s26), %s712_s21 }
   0xc   : > { %s37_s28 = ssub.s32 %s708_s20, %s983_s25  ;;  %p801_p3 = por %p49_p2, %p48_p1 }
   0xd   : > { %p34_p4 = scmp.ge.s32.totalorder %s985_s26, 2  ;;  %p54_p5 = scmp.ne.s32.totalorder %s692_s16, %s688_s15 }
   0xe   : > { %p55_p6 = scmp.eq.s32.totalorder %s481_s23, 0  ;;  %p153_p7 = scmp.eq.s32.totalorder %s481_s23, 3 }
   0xf   : > { %s987_s26 = smov (%p34_p4, %s985_s26), 0  ;;  %p159_p10 = scmp.eq.s32.totalorder %s482_s24, 3 }
  0x10   : > { %965 = sst [smem:[#allocation8_spill]] %s987_s26  ;;  %p809_p8 = por %p55_p6, %p54_p5 }
  0x11   : > { %p813_p9 = por %p153_p7, %p48_p1  ;;  %s36_s6 = ssub.s32 %s712_s21, %s987_s26 }
  0x12   : > { %s38_s7 = sor.u32 %s37_s28, %s36_s6  ;;  %p819_p12 = por %p159_p10, %p54_p5 }
  0x13   : > { %s967_s5 = scalar_select %p813_p9, 1, 0 }
  0x14   : > { %p39_p11 = scmp.eq.s32.totalorder %s38_s7, 0  ;;  %p518_p13 = scmp.lt.s32.totalorder %s716_s22, 4 }
  0x15   : > { %s968_s8 = scalar_select %p819_p12, 1, 0 }
  0x16   : > { %s182_s9 = sand.u32 1, %s696_s17   ;;  %s486_s12 = sshll.u32 %s712_s21, 1 }
  0x17   : > { %s826_s10 = scalar_select %p39_p11, %s696_s17, %s41_s27  }
  0x18   : > { %s485_s11 = sshll.u32 %s182_s9, 3  ;;  %s191_s13 = sadd.s32 %s708_s20, %s486_s12 }
  0x19   : > { %s186_s14 = scalar_lea.vmem [#allocation2], %s485_s11  ;;  %s487_s26 = sshll.u32 %s191_s13, 7 }
  0x1a   : > { %s195_s23 = sshll.u32 %s186_s14, 4  ;;  %s835_s6 = scalar_lea.hbm %s957_s0, %s487_s26  ;;  %s830_s23 = int_to_ptr.vmem [resolvable:$true] %s195_s23 }
  0x1b   : > { %p839_p0 = pnand %p518_p13, %p801_p3  ;;  %s183_s7 = scalar_lea.sflag [#allocation3], %s182_s9 }
  0x1c   : > { %s588_s11 = scalar_lea.hbm %s835_s6, 128  ;;  %s593_s12 = scalar_lea.hbm %s957_s0, 512 }
  0x1d   : > { %p589_p4 = scmp.ne.s32.totalorder %s835_s6, %s588_s11  ;;  %p590_p5 = pneg %p839_p0 }
  0x1e   : > { %p594_p3 = scmp.lt.u32.totalorder %s835_s6, %s957_s0  ;;  %p595_p10 = scmp.lt.u32.totalorder %s593_s12, %s588_s11 }
  0x1f   : > { %p591_p6 = pnand %p590_p5, %p589_p4  ;;  %p597_p13 = scmp.lt.u32.totalorder %s588_s11, %s835_s6 }
  0x20   : > { %p596_p11 = por %p595_p10, %p594_p3 }
  0x21   : > { %p592_p7 = pneg %p591_p6 }
  0x22   : > { %p598_p1 = por %p597_p13, %p596_p11 }
  0x24   : > { %p599_p2 = pnand %p598_p1, %p592_p7 }
  0x26   : > { %602 = shalt.err (!%p599_p2)
}
  0x27   : > { %s603_s9 = scalar_lea.vmem %s830_s23, 128  ;;  %s718_s24 = smov [#allocation2]  }
  0x28   : > { %p604_p4 = scmp.ne.s32.totalorder %s830_s23, %s603_s9  ;;  %s608_s28 = sshll.u32 %s718_s24, 4  ;;  %s609_s28 = int_to_ptr.vmem [resolvable:$false] %s608_s28 }
  0x29   : > { %s610_s26 = scalar_lea.vmem %s609_s28, 256  ;;  %p611_p9 = scmp.lt.s32.totalorder %s830_s23, %s609_s28 }
  0x2a   : > { %p606_p6 = pnand %p604_p4, %p590_p5  ;;  %p612_p3 = scmp.lt.s32.totalorder %s610_s26, %s603_s9 }
  0x2c   : > { %p607_p12 = pneg %p606_p6  ;;  %p613_p10 = por %p612_p3, %p611_p9 }
  0x2e   : > { %p614_p11 = pnand %p613_p10, %p607_p12 }
  0x30   : > { %617 = shalt.err (!%p614_p11)
}
  0x31   : > { %513 = dma.hbm_to_vmem [thread:$0]  (!%p839_p0), %s835_s6, 128, %s830_s23, %s183_s7  }
  0x32   : > { %p970_p1 = scmp.lt.s32.totalorder %s716_s22, 5  ;;  %p971_p2 = scmp.ge.s32.totalorder %s716_s22, 1 }
  0x34   : > { %p215_p5 = pnand %p971_p2, %p970_p1 }
  0x35   : > { %s875_s11 = sand.u32 (!%p215_p5), 1, %s692_s16  }
  0x36   : > { %218 = sbr.rel (%p215_p5) target bundleno = 299 (0x12b), region = 36  ;;  %s489_s29 = sshll.u32 (!%p215_p5), %s875_s11, 3 }
  0x37   : > { %s221_s12 = scalar_lea.sflag (!%p215_p5), [#allocation3], %s875_s11  ;;  %s224_s27 = scalar_lea.vmem (!%p215_p5), [#allocation2], %s489_s29 }
  0x3d   : > { %679 = dma.done.wait (%p809_p8), %s221_s12, 128  }
  0x3e   : > { %681 = vsyncadd (%p809_p8), %s221_s12, 4294967168  ;;  %p257_p9 = scmp.lt.s32.totalorder %s704_s19, 1  ;;  %v719_v0 = vmov 0.0   ;;  %vm720_vm0 = vmmov 0   ;;  %v721_v1 = vmov 0   ;;  %vm267_vm1 = vcmask 64512  }
  0x3f   : > { %501 = vmatprep.subr.mxu0 %v719_v0  ;;  %503 = vmatprep.mubr.msk.f32.mxu0 %vm720_vm0, %v719_v0  ;;  %v266_v2 = vld [vmem:[%s224_s27] sm:$0xff]  ;;  %s495_s12 = sshll.u32 %s704_s19, 1  ;;  %p972_p12 = scmp.ne.s32.totalorder %s967_s5, 0 }
  0x40   : > { %s258_s23 = scalar_select %p257_p9, %s704_s19, 1  ;;  %587 = vset.pattern.permute.xlu0 %v721_v1  ;;  %502 = vmatpush3.msra.mxu0 %v266_v2  ;;  %v348_v5 = vld [vmem:[%s960_s3] sm:$0xff] }
  0x42   : > { %s491_s6 = sshll.u32 %s258_s23, 3  ;;  %s368_s23 = sadd.s32 %s700_s18, %s495_s12 }
  0x43   : > { %s260_s14 = scalar_lea.vmem %s958_s1, %s491_s6  ;;  %s264_s24 = scalar_lea.vmem %s959_s2, %s491_s6 }
  0x44   : > { %v265_v3 = vld [vmem:[%s260_s14] sm:$0xff]  ;;  %s496_s7 = sshll.u32 %s368_s23, 7  ;;  %s256_s6 = scalar_lea.vmem [#allocation5], %s489_s29 }
  0x45   : > { %v341_v4 = vld [vmem:[%s264_s24] sm:$0xff]  ;;  %504 = vmatmul.mubr.msk.f32.vlgmr.msra.gmra.mrb[0].mxu0 %vm267_vm1, %v265_v3  ;;  %s372_s27 = sshll.u32 %s256_s6, 4  ;;  %s903_s9 = scalar_lea.hbm %s961_s4, %s496_s7  ;;  %s905_s27 = int_to_ptr.vmem [resolvable:$true] %s372_s27 }
  0x46   : > { %344 = vperm.xlu0 %587, %v341_v4   ;;  %s357_s18 = scalar_lea.sflag [#allocation4], %s875_s11  ;;  %s618_s19 = scalar_lea.vmem %s905_s27, 128 }
  0x47   : > { %p619_p8 = scmp.ne.s32.totalorder %s905_s27, %s618_s19  ;;  %s722_s29 = smov [#allocation5]  }
  0x48   : > { %s622_s30 = sshll.u32 %s722_s29, 4  ;;  %s623_s30 = int_to_ptr.vmem [resolvable:$false] %s622_s30 }
  0x49   : > { %p620_p0 = pnand %p619_p8, %p972_p12  ;;  %s624_s24 = scalar_lea.vmem %s623_s30, 256 }
  0x4a   : > { %351 = vperm.xlu0 %587, %v348_v5   ;;  %p625_p13 = scmp.lt.s32.totalorder %s905_s27, %s623_s30  ;;  %p626_p4 = scmp.lt.s32.totalorder %s624_s24, %s618_s19 }
  0x4b   : > { %p621_p7 = pneg %p620_p0 }
  0x4c   : > { %p627_p6 = por %p626_p4, %p625_p13 }
  0x4e   : > { %p628_p3 = pnand %p627_p6, %p621_p7 }
  0xc5   : > { %v345_v6 = vpop.permute.xlu0 %344 }
  0xc9   : > { %v352_v10 = vpop.permute.xlu0 %351 }
 0x118   : > { %v337_v7 = vpop.f32.mrb[0].mxu0 }
 0x119   : > { %v347_v8 = vmul.f32 %v345_v6, %v337_v7  ;;  %v505_v9 = vpop.f32.mrb[1].mxu0 }
 0x11b   : > { %v354_v11 = vadd.f32 %v352_v10, %v347_v8 }
 0x11d   : > { %355 = vst [vmem:[%s256_s6] sm:$0xff] %v354_v11 }
 0x11e   : > { %631 = shalt.err (!%p628_p3)
}
 0x11f   : > { %s632_s11 = scalar_lea.hbm %s903_s9, 128  ;;  %s636_s12 = scalar_lea.hbm %s961_s4, 512 }
 0x120   : > { %p633_p10 = scmp.ne.s32.totalorder %s903_s9, %s632_s11  ;;  %p637_p2 = scmp.lt.u32.totalorder %s903_s9, %s961_s4 }
 0x121   : > { %p638_p5 = scmp.lt.u32.totalorder %s636_s12, %s632_s11  ;;  %p640_p8 = scmp.lt.u32.totalorder %s632_s11, %s903_s9 }
 0x122   : > { %p634_p11 = pnand %p633_p10, %p972_p12 }
 0x123   : > { %p639_p9 = por %p638_p5, %p637_p2 }
 0x124   : > { %p635_p1 = pneg %p634_p11 }
 0x125   : > { %p641_p0 = por %p640_p8, %p639_p9 }
 0x127   : > { %p642_p7 = pnand %p641_p0, %p635_p1 }
 0x129   : > { %645 = shalt.err (!%p642_p7)
}
 0x12a   : > { %508 = dma.vmem_to_hbm [thread:$0]  (%p972_p12), %s905_s27, 128, %s903_s9, %s357_s18  }
 0x12b PF: > { %p519_p13 = scmp.ge.s32.totalorder %s716_s22, 2  ;;  %s384_s6 = sand.u32 1, %s688_s15  }
 0x12c   : > { %p973_p4 = scmp.ne.s32.totalorder %s968_s8, 0  ;;  %s385_s13 = scalar_lea.sflag [#allocation4], %s384_s6 }
 0x12e   : > { %p515_p6 = pnand %p519_p13, %p973_p4 }
 0x130   : > { %683 = dma.done.wait (!%p515_p6), %s385_s13, 128  }
 0x131   : > { %685 = vsyncadd (!%p515_p6), %s385_s13, 4294967168  ;;  %s20_s22 = sadd.s32 1, %s716_s22   ;;  %s974_s5 = sld [smem:[#allocation8_spill]] }
 0x132   : > { %p17_p3 = scmp.ge.s32.totalorder %s20_s22, 6   ;;  %s975_s15 = smov %s692_s16 }
 0x133   : > { %s976_s16 = smov %s696_s17  ;;  %s977_s17 = smov %s826_s10 }
 0x134   : > { %s978_s18 = smov %s708_s20  ;;  %s979_s19 = smov %s712_s21 }
 0x135   : > { %s980_s20 = smov %s983_s25  ;;  %19 = sbr.rel (!%p17_p3) target bundleno = 7 (0x7), region = 87 }
 0x137   : > { %s981_s21 = smov %s974_s5 }
 0x13c   :  { %390 = vsyncpa [#allocation3], 1 }
 0x13d   :  { %392 = vsyncpa [#allocation3 + $0x1], 1 }
 0x13e   :  { %393 = vsyncpa [#allocation4], 1 }
 0x13f   :  { %395 = vsyncpa [#allocation4 + $0x1], 1 }

</bundles_post_ra>
